<compile_context>
chip_gen: v7x
topology: tpu7x:2x2x1
jax: 0.10.0
libtpu: 0.0.40
codegen_flags: <defaults>
</compile_context>

<pallas_src>
import functools

import jax
import jax.numpy as jnp
from jax.experimental import pallas as pl
from jax.experimental.pallas import tpu as pltpu

_LANES = 128  # vreg lane width


def _residual_add_kernel(fx_ref, res_ref, o_ref):
    """One lane-dense (t, 128) block: pure VPU elementwise add."""
    o_ref[...] = fx_ref[...] + res_ref[...]


def _round_up(x: int, m: int) -> int:
    return -(-x // m) * m


def _sublanes_for(dtype) -> int:
    # Sub-32-bit dtypes pack along sublanes: f32 -> 8, bf16/f16 -> 16, int8/fp8 -> 32.
    return max(8, 32 // jnp.dtype(dtype).itemsize)


@functools.lru_cache(maxsize=1)
def _chip_profile():
    """Return (num_tensorcores, target_block_bytes) for the local TPU generation."""
    kind = ""
    try:
        kind = jax.devices()[0].device_kind.lower()
    except Exception:  # pragma: no cover - conservative fallback
        pass
    if "v7" in kind:
        # 2 TCs; at 3.2 TB/s a 1 MiB tile DMAs in ~0.31 us (~ per-step overhead),
        # so use 4 MiB blocks.  3 arrays x 2 bufs x 4 MiB = 24 MiB < 32 MiB scoped.
        return 2, 4 << 20
    if "v6" in kind:
        # 1 TC, 32 MiB scoped default -> 2 MiB blocks (12 MiB total double-buffered).
        return 1, 2 << 20
    # v5e / unknown: 16 MiB scoped default -> 1 MiB blocks (6 MiB total).
    return 1, 1 << 20


def _pick_tile(rows: int, sub: int, num_tc: int, target_bytes: int, itemsize: int) -> int:
    """Pick the row-tile size for a (rows, 128) lane-dense layout."""
    t = max(sub, (target_bytes // (_LANES * itemsize)) // sub * sub)
    if t >= rows:
        # Single full block (legal regardless of sublane multiple since it
        # equals the full array dim).
        t = rows
    steps = pl.cdiv(rows, t)
    if num_tc >= 2 and rows >= 2 * sub and steps % 2 == 1:
        # Even number of grid steps so both TensorCores get equal tile counts
        # under dimension_semantics=("parallel",).
        steps += 1
        t = _round_up(pl.cdiv(rows, steps), sub)
    return t


def residual_add(fx: jax.Array, res: jax.Array, *, target_block_bytes: int | None = None) -> jax.Array:
    """Pallas TPU implementation of the residual add: `fx + res`."""
    assert fx.shape == res.shape, "fn(x) must preserve x's shape for x += res"
    assert fx.dtype == res.dtype, "dtype mismatch between fn(x) and residual"
    orig_shape, dtype = fx.shape, fx.dtype
    n = fx.size
    if n == 0:
        return fx

    itemsize = jnp.dtype(dtype).itemsize
    sub = _sublanes_for(dtype)
    num_tc, default_block_bytes = _chip_profile()
    if target_block_bytes is None:
        target_block_bytes = default_block_bytes

    aligned = (n % _LANES) == 0
    if aligned:
        # Normal ViT case (hidden divisible by 128): zero-copy lane-dense view.
        rows = n // _LANES
        a = fx.reshape(rows, _LANES)
        b = res.reshape(rows, _LANES)
    else:
        # Ragged tail: pad the flat vector up to whole 128-lane rows (rounded to
        # the dtype sublane multiple).  Only hit for sizes not divisible by 128.
        rows = _round_up(pl.cdiv(n, _LANES), sub)
        pad = rows * _LANES - n
        a = jnp.pad(fx.reshape(-1), (0, pad)).reshape(rows, _LANES)
        b = jnp.pad(res.reshape(-1), (0, pad)).reshape(rows, _LANES)

    t = _pick_tile(rows, sub, num_tc, target_block_bytes, itemsize)
    grid = (pl.cdiv(rows, t),)

    out = pl.pallas_call(
        _residual_add_kernel,
        out_shape=jax.ShapeDtypeStruct((rows, _LANES), dtype),
        grid=grid,
        in_specs=[pl.BlockSpec((t, _LANES), lambda i: (i, 0)),
                  pl.BlockSpec((t, _LANES), lambda i: (i, 0))],
        out_specs=pl.BlockSpec((t, _LANES), lambda i: (i, 0)),
        input_output_aliases={0: 0},
        compiler_params=pltpu.CompilerParams(
            dimension_semantics=("parallel",)),
    )(a, b)

    if aligned:
        return out.reshape(orig_shape)
    return out.reshape(-1)[:n].reshape(orig_shape)


def residual_add_module(fn, x, **kwargs):
    """Equivalent of ResidualAdd(fn)(x, **kwargs): out = fn(x, **kwargs) + x."""
    # TODO(synk): the wrapped `fn` is an arbitrary sub-module and runs as plain
    # JAX; ideally the `+ x` is fused into fn's final-op epilogue (removing one
    # full read+write of fn(x)) — the standalone Pallas add below is the
    # best-possible 3n-byte roofline pass when that fusion isn't available.
    return residual_add(fn(x, **kwargs), x)


if __name__ == "__main__":
    key = jax.random.PRNGKey(0)
    k_x, k_w, k_b = jax.random.split(key, 3)

    # Small ViT-like shapes: batch=2, seq=8, hidden=32 (n % 128 == 0 fast path).
    batch, seq, hidden = 2, 8, 32
    x = jax.random.normal(k_x, (batch, seq, hidden), dtype=jnp.float32)
    w = jax.random.normal(k_w, (hidden, hidden), dtype=jnp.float32) / jnp.sqrt(hidden)
    bias = jax.random.normal(k_b, (hidden,), dtype=jnp.float32)

    # Stand-in for the wrapped sub-block (e.g. the MLP inside a ViT encoder layer).
    def fn(v):
        return jax.nn.gelu(v @ w + bias)

    block = jax.jit(lambda v: residual_add_module(fn, v))
    out = jax.block_until_ready(block(x))
    ref = fn(x) + x
    assert out.shape == x.shape and out.dtype == x.dtype
    assert jnp.allclose(out, ref, atol=1e-5, rtol=1e-5), "mismatch vs reference (aligned f32)"

    # Ragged path (n % 128 != 0): identity fn, pure residual add.
    x2 = jax.random.normal(k_x, (2, 8, 33), dtype=jnp.float32)
    out2 = jax.block_until_ready(residual_add(x2 * 2.0, x2))
    assert jnp.allclose(out2, x2 * 3.0, atol=1e-5, rtol=1e-5), "mismatch vs reference (ragged)"

    # bf16 path (dtype-aware sublane rounding / tiling).
    x3 = jax.random.normal(k_b, (2, 8, 32), dtype=jnp.bfloat16)
    out3 = jax.block_until_ready(residual_add(x3 * jnp.bfloat16(2.0), x3))
    assert jnp.allclose(out3.astype(jnp.float32), (x3 * jnp.bfloat16(2.0) + x3).astype(jnp.float32),
                        atol=1e-2, rtol=1e-2), "mismatch vs reference (bf16)"

    print("KERNEL_OK")
</pallas_src>

<mosaic_0001>
module attributes {stable_mosaic.version = 11 : i64} {
  func.func @_residual_add_kernel(%arg0: i32, %arg1: memref<4x128xf32, #tpu.memory_space<vmem>>, %arg2: memref<4x128xf32, #tpu.memory_space<vmem>>, %arg3: memref<4x128xf32, #tpu.memory_space<vmem>>) attributes {dimension_semantics = [#tpu.dimension_semantics<parallel>], iteration_bounds = array<i64: 1>, scalar_prefetch = 0 : i64, scratch_operands = 0 : i64, tpu.core_type = #tpu.core_type<tc>, window_params = [{transform_indices = @transform_0, window_bounds = array<i64: 4, 128>}, {transform_indices = @transform_1, window_bounds = array<i64: 4, 128>}, {transform_indices = @transform_2, window_bounds = array<i64: 4, 128>}]} {
    %c0 = arith.constant 0 : index
    %c0_0 = arith.constant 0 : index
    %0 = vector.load %arg1[%c0, %c0_0] : memref<4x128xf32, #tpu.memory_space<vmem>>, vector<4x128xf32>
    %c0_1 = arith.constant 0 : index
    %c0_2 = arith.constant 0 : index
    %1 = vector.load %arg2[%c0_1, %c0_2] : memref<4x128xf32, #tpu.memory_space<vmem>>, vector<4x128xf32>
    %2 = arith.addf %0, %1 : vector<4x128xf32>
    %c0_3 = arith.constant 0 : index
    %c0_4 = arith.constant 0 : index
    %3 = vector.load %arg3[%c0_3, %c0_4] : memref<4x128xf32, #tpu.memory_space<vmem>>, vector<4x128xf32>
    tpu.vector_store %arg3[%c0_3, %c0_4], %2 {strides = array<i32>} : memref<4x128xf32, #tpu.memory_space<vmem>>, vector<4x128xf32>,
    return
  }
  func.func @transform_0(%arg0: i32) -> (i32, i32) {
    %c0_i32 = arith.constant 0 : i32
    %c0_i32_0 = arith.constant 0 : i32
    return %arg0, %c0_i32 : i32, i32
  }
  func.func @transform_1(%arg0: i32) -> (i32, i32) {
    %c0_i32 = arith.constant 0 : i32
    %c0_i32_0 = arith.constant 0 : i32
    return %arg0, %c0_i32 : i32, i32
  }
  func.func @transform_2(%arg0: i32) -> (i32, i32) {
    %c0_i32 = arith.constant 0 : i32
    %c0_i32_0 = arith.constant 0 : i32
    return %arg0, %c0_i32 : i32, i32
  }
}

</mosaic_0001>

<bundles_post_ra>
// kernel: _lambda_.1
= control target key start
LH: loop header
LB: loop body
LE: loop exit
PB: predicated region body
PF: predicated region fallthrough
CT: control target
= control target key end

     0   :  { %s43_s0 = inlined_call_operand.vmem [shape: f32[4,128], index: 0, kind: input, shape index: {}, may-alias: {0,2}]   ;;  %s44_s1 = inlined_call_operand.vmem [shape: f32[4,128], index: 1, kind: input, shape index: {}]   ;;  %s45_s2 = inlined_call_operand.vmem [shape: f32[4,128], index: 2, kind: output, shape index: {}, may-alias: {0,2}]  }
   0x1   :  { %v11_v0 = vld [vmem:[%s43_s0] sm:$0xf] }
   0x2   :  { %v12_v1 = vld [vmem:[%s44_s1] sm:$0xf] }
   0x3   :  { %v13_v2 = vadd.f32 %v12_v1, %v11_v0 }
   0x5   :  { %14 = vst [vmem:[%s45_s2] sm:$0xf] %v13_v2 }

</bundles_post_ra>
